<compile_context>
chip_gen: v7x
topology: tpu7x:2x2x1
jax: 0.10.0
libtpu: 0.0.40
codegen_flags: <defaults>
</compile_context>

<pallas_src>
import functools

import jax
import jax.numpy as jnp
from jax.experimental import pallas as pl
from jax.experimental.pallas import tpu as pltpu


def _round_up(x, m):
    return (x + m - 1) // m * m


def _graph_mapper_kernel(x_ref, w1_ref, w2_ref, b2_ref, out_ref):
    # x_ref  : (1, K1p)   bf16  flattened adjacency + constant-1 (bias) column
    # w1_ref : (K1p, N1p) bf16  W1 of all windows concatenated along outputs,
    #                           with b1 folded in as row `in_dim`
    # w2_ref : (N1p, N2p) bf16  block-diagonal per-window W2
    # b2_ref : (1, N2p)   f32   concatenated layer-2 biases
    # out_ref: (1, N2p)   f32   lane-dense output slab (N2p % 128 == 0)
    h = jnp.dot(x_ref[...], w1_ref[...], preferred_element_type=jnp.float32)
    h = jnp.maximum(h, 0.0)                                    # (1, N1p) f32
    y = jnp.dot(h.astype(w2_ref.dtype), w2_ref[...],
                preferred_element_type=jnp.float32) + b2_ref[...]
    out_ref[...] = jnp.maximum(y, 0.0)                         # (1, N2p) f32


@functools.partial(jax.jit, static_argnames=("node_num", "param_dtype"))
def graph_mapper_forward(global_adj, w1, b1, w2, b2, *, node_num,
                         param_dtype=jnp.bfloat16):
    """
    global_adj: (node_num, node_num) f32
    w1: (W, in_dim, hidden)   b1: (W, hidden)      (weights pre-transposed: (in, out))
    w2: (W, hidden, out_dim)  b2: (W, out_dim)     with out_dim == node_num**2
    Returns the stacked (W, node_num, node_num) per-window adjacency array.
    """
    W, in_dim, hidden = w1.shape
    out_dim = w2.shape[-1]

    K1 = in_dim + 1                       # +1 column carries the layer-1 bias
    K1p = _round_up(K1, 8)                # sublane-align contraction dim
    N1 = W * hidden
    N1p = _round_up(N1, 128)              # lane-align layer-1 output
    N2 = W * out_dim
    N2p = _round_up(N2, 128)              # lane-align layer-2 output

    # ---- packing (plain XLA ops, fused under jit; done once per call) ----
    x = global_adj.reshape(1, in_dim).astype(jnp.float32)
    x_aug = jnp.zeros((1, K1p), jnp.float32)
    x_aug = x_aug.at[:, :in_dim].set(x).at[:, in_dim].set(1.0)

    w1cat = jnp.zeros((K1p, N1p), jnp.float32)
    w1cat = w1cat.at[:in_dim, :N1].set(
        jnp.transpose(w1, (1, 0, 2)).reshape(in_dim, N1))
    w1cat = w1cat.at[in_dim, :N1].set(b1.reshape(N1))           # fold b1

    w2bd = jnp.zeros((N1p, N2p), jnp.float32)
    for wi in range(W):                                         # block-diagonal
        w2bd = w2bd.at[wi * hidden:(wi + 1) * hidden,
                       wi * out_dim:(wi + 1) * out_dim].set(w2[wi])

    b2row = jnp.zeros((1, N2p), jnp.float32).at[0, :N2].set(b2.reshape(N2))

    out = pl.pallas_call(
        _graph_mapper_kernel,
        out_shape=jax.ShapeDtypeStruct((1, N2p), jnp.float32),
        in_specs=[pl.BlockSpec(memory_space=pltpu.MemorySpace.VMEM)] * 4,
        out_specs=pl.BlockSpec(memory_space=pltpu.MemorySpace.VMEM),
    )(x_aug.astype(param_dtype),
      w1cat.astype(param_dtype),
      w2bd.astype(param_dtype),
      b2row)

    # TODO(synk): for large node_num/hidden add a K-tiling grid axis (f32 VMEM
    # accumulator + pl.when init/finalize) and raise vmem_limit_bytes so the
    # weight slabs stay within v7x's 64 MiB VMEM budget.
    return out[:, :N2].reshape(W, node_num, node_num)


def _reference(global_adj, w1, b1, w2, b2, node_num, param_dtype=None):
    """Per-window reference. If param_dtype is given, MXU inputs are rounded to
    that dtype (matching the kernel's bf16 path) while accumulation stays f32."""
    def cast(a):
        return a.astype(param_dtype) if param_dtype is not None else a
    x = global_adj.reshape(1, -1).astype(jnp.float32)
    outs = []
    for i in range(w1.shape[0]):
        h = jnp.dot(cast(x), cast(w1[i]), preferred_element_type=jnp.float32)
        h = jnp.maximum(h + cast(b1[i]).astype(jnp.float32), 0.0)
        y = jnp.dot(cast(h), cast(w2[i]), preferred_element_type=jnp.float32)
        y = jnp.maximum(y + b2[i].astype(jnp.float32), 0.0)
        outs.append(y.reshape(node_num, node_num))
    return jnp.stack(outs)


if __name__ == "__main__":
    # Small, forward-consistent shapes: in_dim must equal node_num**2.
    node_num = 8
    in_dim = node_num * node_num      # 64
    window_num = 4
    hidden_dim = 32
    out_dim = node_num * node_num     # 64

    key = jax.random.PRNGKey(0)
    k_adj, k_w1, k_b1, k_w2, k_b2 = jax.random.split(key, 5)

    global_adj = jax.random.uniform(k_adj, (node_num, node_num), jnp.float32)
    w1 = jax.random.normal(k_w1, (window_num, in_dim, hidden_dim), jnp.float32) * 0.1
    b1 = jax.random.normal(k_b1, (window_num, hidden_dim), jnp.float32) * 0.1
    w2 = jax.random.normal(k_w2, (window_num, hidden_dim, out_dim), jnp.float32) * 0.1
    b2 = jax.random.normal(k_b2, (window_num, out_dim), jnp.float32) * 0.1

    window_adj = graph_mapper_forward(global_adj, w1, b1, w2, b2,
                                      node_num=node_num)
    window_adj = jax.block_until_ready(window_adj)
    assert window_adj.shape == (window_num, node_num, node_num)

    # 1) Kernel-math check: reference with identical bf16 MXU inputs / f32 acc.
    ref_bf16 = _reference(global_adj, w1, b1, w2, b2, node_num,
                          param_dtype=jnp.bfloat16)
    assert jnp.allclose(window_adj, ref_bf16, atol=1e-4, rtol=1e-4), \
        "mismatch vs same-precision reference"

    # 2) Module-semantics check: full-f32 reference, bf16-rounding tolerance.
    ref_f32 = _reference(global_adj, w1, b1, w2, b2, node_num)
    assert jnp.allclose(window_adj, ref_f32, atol=5e-2, rtol=5e-2), \
        "mismatch vs f32 reference"

    print("KERNEL_OK")
</pallas_src>

<mosaic_0001>
module attributes {stable_mosaic.version = 11 : i64} {
  func.func @_graph_mapper_kernel(%arg0: memref<1x72xbf16, #tpu.memory_space<vmem>>, %arg1: memref<72x128xbf16, #tpu.memory_space<vmem>>, %arg2: memref<128x256xbf16, #tpu.memory_space<vmem>>, %arg3: memref<1x256xf32, #tpu.memory_space<vmem>>, %arg4: memref<1x256xf32, #tpu.memory_space<vmem>>) attributes {dimension_semantics = [], scalar_prefetch = 0 : i64, scratch_operands = 0 : i64, tpu.core_type = #tpu.core_type<tc>} {
    %c0 = arith.constant 0 : index
    %c0_0 = arith.constant 0 : index
    %0 = vector.load %arg0[%c0, %c0_0] : memref<1x72xbf16, #tpu.memory_space<vmem>>, vector<1x72xbf16>
    %c0_1 = arith.constant 0 : index
    %c0_2 = arith.constant 0 : index
    %1 = vector.load %arg1[%c0_1, %c0_2] : memref<72x128xbf16, #tpu.memory_space<vmem>>, vector<72x128xbf16>
    %cst = arith.constant dense<0.000000e+00> : vector<1x128xf32>
    %2 = tpu.matmul %0, %1, %cst {dimension_numbers = #tpu.dot_dimension_numbers<[1], [0], [0], [1], [0, 0, 1, 1], [], []>} : vector<1x72xbf16>, vector<72x128xbf16>, vector<1x128xf32> -> vector<1x128xf32>
    %cst_3 = arith.constant 0.000000e+00 : f32
    %3 = vector.broadcast %cst_3 : f32 to vector<1x128xf32>
    %4 = arith.maximumf %2, %3 : vector<1x128xf32>
    %5 = arith.truncf %4 : vector<1x128xf32> to vector<1x128xbf16>
    %c0_4 = arith.constant 0 : index
    %c0_5 = arith.constant 0 : index
    %6 = vector.load %arg2[%c0_4, %c0_5] : memref<128x256xbf16, #tpu.memory_space<vmem>>, vector<128x256xbf16>
    %cst_6 = arith.constant dense<0.000000e+00> : vector<1x256xf32>
    %7 = tpu.matmul %5, %6, %cst_6 {dimension_numbers = #tpu.dot_dimension_numbers<[1], [0], [0], [1], [0, 0, 1, 1], [], []>} : vector<1x128xbf16>, vector<128x256xbf16>, vector<1x256xf32> -> vector<1x256xf32>
    %c0_7 = arith.constant 0 : index
    %c0_8 = arith.constant 0 : index
    %8 = vector.load %arg3[%c0_7, %c0_8] : memref<1x256xf32, #tpu.memory_space<vmem>>, vector<1x256xf32>
    %9 = arith.addf %7, %8 : vector<1x256xf32>
    %cst_9 = arith.constant 0.000000e+00 : f32
    %10 = vector.broadcast %cst_9 : f32 to vector<1x256xf32>
    %11 = arith.maximumf %9, %10 : vector<1x256xf32>
    %c0_10 = arith.constant 0 : index
    %c0_11 = arith.constant 0 : index
    %12 = vector.load %arg4[%c0_10, %c0_11] : memref<1x256xf32, #tpu.memory_space<vmem>>, vector<1x256xf32>
    tpu.vector_store %arg4[%c0_10, %c0_11], %11 {strides = array<i32>} : memref<1x256xf32, #tpu.memory_space<vmem>>, vector<1x256xf32>,
    return
  }
}

</mosaic_0001>

<bundles_post_ra>
// kernel: graph_mapper_forward.1
= control target key start
LH: loop header
LB: loop body
LE: loop exit
PB: predicated region body
PF: predicated region fallthrough
CT: control target
= control target key end

     0   :  { %v358_v0 = vmov 0.0   ;;  %vm359_vm0 = vmmov 0   ;;  %vm59_vm1 = vcmask 1043456   ;;  %vm55_vm2 = vcmask 588800   ;;  %s459_s1 = inlined_call_operand.vmem [shape: bf16[72,128], index: 1, kind: input, shape index: {}]   ;;  %s460_s2 = inlined_call_operand.vmem [shape: bf16[128,256], index: 2, kind: input, shape index: {}]   ;;  %s461_s0 = inlined_call_operand.vmem [shape: bf16[1,72], index: 0, kind: input, shape index: {}]   ;;  %s462_s3 = inlined_call_operand.vmem [shape: f32[1,256], index: 3, kind: input, shape index: {}]   ;;  %s463_s4 = inlined_call_operand.vmem [shape: f32[1,256], index: 4, kind: output, shape index: {}]  }
   0x1   :  { %311 = vmatprep.subr.bf16.mxu0 %v358_v0  ;;  %v329_v1 = vld [vmem:[%s459_s1] sm:$0xff]   ;;  %321 = vmatprep.mubr.msk.bf16.mxu0 %vm359_vm0, %v358_v0  ;;  %v330_v2 = vld [vmem:[%s459_s1 + $0x8] sm:$0xff]   ;;  %v331_v3 = vld [vmem:[%s459_s1 + $0x10] sm:$0xff]   ;;  %v360_v24 = vmov 0   ;;  %v203_v31 = vlaneseq  ;;  %v361_v36 = vmov 1966171168  }
   0x2   :  { %312 = vmatpush3.bf16.msra.mxu0 %v329_v1  ;;  %v334_v4 = vld [vmem:[%s460_s2 + $0x4] ss:$8 sps:$4 sm:$0xff]   ;;  %v336_v5 = vld [vmem:[%s460_s2] ss:$8 sps:$4 sm:$0xff]   ;;  %v337_v6 = vld [vmem:[%s460_s2 + $0x14] ss:$8 sps:$4 sm:$0xff]   ;;  %245 = vmatprep.mubr.bf16.mxu1 %v360_v24  ;;  %v260_v37 = vunpack.c.l.s4 %v361_v36 }
   0x3   :  { %313 = vmatprep.subr.bf16.mxu0 %v358_v0  ;;  %213 = vmatprep.subr.bf16.mxu1 %v334_v4  ;;  %v339_v7 = vld [vmem:[%s460_s2 + $0x10] ss:$8 sps:$4 sm:$0xff]   ;;  %v340_v8 = vld [vmem:[%s460_s2 + $0x24] ss:$8 sps:$4 sm:$0xff]   ;;  %v333_v10 = vld [vmem:[%s459_s1 + $0x20] ss:$0 sps:$4 sm:$0xff]  }
   0x4   :  { %214 = vmatpush1.bf16.msra.mxu1 %v336_v5  ;;  %v332_v9 = vld [vmem:[%s459_s1 + $0x18] sm:$0xff]   ;;  %v342_v11 = vld [vmem:[%s460_s2 + $0x20] ss:$8 sps:$4 sm:$0xff]   ;;  %v61_v13 = vsel %vm59_vm1, %v333_v10, 0  ;;  %v346_v15 = vld [vmem:[%s460_s2 + $0x44] ss:$8 sps:$4 sm:$0xff]   ;;  %v261_v41 = vunpack.c.0.s8 %v260_v37 }
   0x5   :  { %215 = vmatprep.subr.bf16.mxu1 %v337_v6  ;;  %v343_v12 = vld [vmem:[%s460_s2 + $0x34] ss:$8 sps:$4 sm:$0xff]   ;;  %v345_v14 = vld [vmem:[%s460_s2 + $0x30] ss:$8 sps:$4 sm:$0xff]   ;;  %v18_v16 = vld [vmem:[%s461_s0] sm:$0x1] }
   0x6   :  { %314 = vmatpush3.bf16.msra.mxu0 %v330_v2  ;;  %v348_v17 = vld [vmem:[%s460_s2 + $0x40] ss:$8 sps:$4 sm:$0xff]   ;;  %v349_v18 = vld [vmem:[%s460_s2 + $0x54] ss:$8 sps:$4 sm:$0xff]   ;;  %v351_v19 = vld [vmem:[%s460_s2 + $0x50] ss:$8 sps:$4 sm:$0xff]  }
   0x7   :  { %315 = vmatprep.subr.bf16.mxu0 %v358_v0  ;;  %v352_v20 = vld [vmem:[%s460_s2 + $0x64] ss:$8 sps:$4 sm:$0xff]   ;;  %v354_v21 = vld [vmem:[%s460_s2 + $0x60] ss:$8 sps:$4 sm:$0xff]   ;;  %v355_v22 = vld [vmem:[%s460_s2 + $0x74] ss:$8 sps:$4 sm:$0xff]  }
   0x8   :  { %216 = vmatpush1.bf16.msra.mxu1 %v339_v7  ;;  %v357_v23 = vld [vmem:[%s460_s2 + $0x70] ss:$8 sps:$4 sm:$0xff]   ;;  %v204_v32 = vshrl.u32 %v203_v31, 7  ;;  %v121_v34 = vld [vmem:[%s462_s3] sm:$0x3]  ;;  %vm276_vm3 = vcmp.lt.s32.totalorder %v203_v31, 256 }
   0x9   :  { %217 = vmatprep.subr.bf16.mxu1 %v340_v8 }
   0xa   :  { %316 = vmatpush3.bf16.msra.mxu0 %v331_v3  ;;  %v205_v33 = vsub.s32 0, %v204_v32  ;;  %v209_v35 = vsub.s32 1, %v204_v32  ;;  %v264_v49 = vsub.s32 %v261_v41, %v204_v32 }
   0xb   :  { %317 = vmatprep.subr.bf16.mxu0 %v358_v0 }
   0xc   :  { %218 = vmatpush1.bf16.msra.mxu1 %v342_v11  ;;  %v206_v38 = vrot.slane %v121_v34, %v205_v33  ;;  %v210_v39 = vrot.slane %v121_v34, %v209_v35 }
   0xd   :  { %219 = vmatprep.subr.bf16.mxu1 %v343_v12 }
   0xe   :  { %318 = vmatpush3.bf16.msra.mxu0 %v332_v9 }
   0xf   :  { %319 = vmatprep.subr.bf16.mxu0 %v358_v0 }
  0x10   :  { %220 = vmatpush1.bf16.msra.mxu1 %v345_v14 }
  0x11   :  { %221 = vmatprep.subr.bf16.mxu1 %v346_v15 }
  0x12   :  { %320 = vmatpush3.bf16.msra.mxu0 %v61_v13 }
  0x14   :  { %222 = vmatpush1.bf16.msra.mxu1 %v348_v17 }
  0x15   :  { %322 = vmatmul.mubr.msk.bf16.vlgmr.msra.gmra.mrb[0].mxu0 %vm55_vm2, %v18_v16  ;;  %223 = vmatprep.subr.bf16.mxu1 %v349_v18 }
  0x18   :  { %224 = vmatpush1.bf16.msra.mxu1 %v351_v19 }
  0x19   :  { %225 = vmatprep.subr.bf16.mxu1 %v352_v20 }
  0x1c   :  { %226 = vmatpush1.bf16.msra.mxu1 %v354_v21 }
  0x1d   :  { %227 = vmatprep.subr.bf16.mxu1 %v355_v22 }
  0x20   :  { %228 = vmatpush1.bf16.msra.mxu1 %v357_v23 }
  0xe8   :  { %v97_v25 = vpop.f32.mrb[0].mxu0 }
  0xe9   :  { %v103_v26 = vmax.f32 %v97_v25, 0.0  ;;  %v323_v27 = vpop.f32.mrb[1].mxu0 }
  0xea   :  { %v100_v28 = vpop.f32.mrb[2].mxu0 }
  0xeb   :  { %v104_v29 = vpack.c.bf16 %v103_v26, %v103_v26  ;;  %v324_v30 = vpop.f32.mrb[3].mxu0 }
  0xed   :  { %246 = vmatmul.mubr.bf16.vlgmr.msra.gmra.mrb[0].mxu1 %v104_v29 }
 0x1c0   :  { %v247_v40 = vpop.f32.mrb[0].mxu1 }
 0x1c1   :  { %v248_v42 = vadd.f32 %v247_v40, %v206_v38  ;;  %v249_v43 = vpop.f32.mrb[1].mxu1 }
 0x1c2   :  { %v250_v44 = vadd.f32 %v249_v43, %v210_v39  ;;  %v251_v45 = vpop.f32.mrb[2].mxu1 }
 0x1c3   :  { %v254_v46 = vmax.f32 %v248_v42, 0.0  ;;  %v252_v47 = vpop.f32.mrb[3].mxu1 }
 0x1c4   :  { %v255_v48 = vmax.f32 %v250_v44, 0.0 }
 0x1c6   :  { %v258_v50 = vcombine.low %v254_v46, %v255_v48 }
 0x1c8   :  { %v265_v51 = vrot.slane %v258_v50, %v264_v49 }
 0x1ca   :  { %v272_v52 = vrot.slane %v265_v51, %v264_v49 }
 0x1cc   :  { %278 = vst.msk [vmem:[%s463_s4] sm:$0x3] %vm276_vm3, %v272_v52 }

</bundles_post_ra>
